<compile_context>
chip_gen: v7x
topology: tpu7x:2x2x1
jax: 0.10.0
libtpu: 0.0.40
codegen_flags: <defaults>
</compile_context>

<pallas_src>
import functools

import jax
import jax.numpy as jnp
from jax.experimental import pallas as pl
from jax.experimental.pallas import tpu as pltpu


def _round_up(n, m):
    return ((n + m - 1) // m) * m


def _mlp_kernel(x_ref, w1_ref, b1_ref, w2_ref, b2_ref, w3_ref, b3_ref,
                o_ref, *, b_actual):
    i = pl.program_id(0)
    tb = x_ref.shape[0]

    # ---- MLP for this batch tile (bf16 on the MXU, f32 elementwise) ----
    x = x_ref[...]  # already bf16 from the wrapper
    h = jnp.dot(x, w1_ref[...], preferred_element_type=jnp.float32) + b1_ref[...]
    h = jnp.maximum(h, 0.0).astype(jnp.bfloat16)

    h = jnp.dot(h, w2_ref[...], preferred_element_type=jnp.float32) + b2_ref[...]
    h = jnp.maximum(h, 0.0).astype(jnp.bfloat16)

    logits = jnp.dot(h, w3_ref[...], preferred_element_type=jnp.float32) + b3_ref[...]

    # Write this tile's (lane-padded) logits directly into the resident output block.
    row0 = pl.multiple_of(i * tb, tb)
    o_ref[pl.ds(row0, tb), :] = logits

    # ---- Finalize in place: column-wise (dim=0) log-softmax over the whole batch ----
    @pl.when(i == pl.num_programs(0) - 1)
    def _():
        rows = jax.lax.broadcasted_iota(jnp.int32, o_ref.shape, 0)
        lg = jnp.where(rows < b_actual, o_ref[...], -jnp.inf)  # mask batch padding
        m = jnp.max(lg, axis=0, keepdims=True)
        lse = m + jnp.log(jnp.sum(jnp.exp(lg - m), axis=0, keepdims=True))
        o_ref[...] = (lg - lse).astype(o_ref.dtype)


def classifier_mlp_forward(x, w1, b1, w2, b2, w3, b3, *, block_b=None):
    """x: (B, in_dim) f32. Weights pre-transposed: w* is (in, out), b* is (1, out)."""
    B, in_dim = x.shape
    hidden = w1.shape[1]
    out_dim = w3.shape[1]

    OUT_PAD = 128  # lane-dense output stores

    if block_b is None:
        # Single grid step for small batches; 256-row tiles for larger ones
        # (use 128 when hand-tuning for v5e's 128-row MXU).
        block_b = min(_round_up(B, 8), 256)
    B_pad = pl.cdiv(B, block_b) * block_b
    nb = B_pad // block_b

    if B_pad != B:
        x = jnp.pad(x, ((0, B_pad - B), (0, 0)))
    w3p = jnp.pad(w3, ((0, 0), (0, OUT_PAD - out_dim)))
    b3p = jnp.pad(b3, ((0, 0), (0, OUT_PAD - out_dim)))

    # bf16 on the MXU path; biases stay f32 (elementwise math stays f32 in-kernel).
    x_bf = x.astype(jnp.bfloat16)
    w1_bf = w1.astype(jnp.bfloat16)
    w2_bf = w2.astype(jnp.bfloat16)
    w3_bf = w3p.astype(jnp.bfloat16)

    # Rough VMEM footprint (double-buffered inputs + resident output) + headroom.
    est_bytes = (
        2 * (block_b * in_dim * 2)                       # x tiles (bf16, 2 buffers)
        + 2 * 2 * (in_dim * hidden + hidden * hidden + hidden * OUT_PAD)  # weights bf16
        + 2 * 4 * (2 * hidden + OUT_PAD)                 # biases f32
        + 2 * (B_pad * OUT_PAD * 4)                      # resident output block f32
        + (2 << 20)
    )
    vmem_limit = max(est_bytes, 32 * 1024 * 1024)

    kernel = functools.partial(_mlp_kernel, b_actual=B)

    out = pl.pallas_call(
        kernel,
        out_shape=jax.ShapeDtypeStruct((B_pad, OUT_PAD), jnp.float32),
        grid_spec=pltpu.PrefetchScalarGridSpec(
            num_scalar_prefetch=0,
            grid=(nb,),
            in_specs=[
                pl.BlockSpec((block_b, in_dim), lambda i: (i, 0)),   # x streams
                pl.BlockSpec((in_dim, hidden), lambda i: (0, 0)),    # weights stay resident
                pl.BlockSpec((1, hidden), lambda i: (0, 0)),
                pl.BlockSpec((hidden, hidden), lambda i: (0, 0)),
                pl.BlockSpec((1, hidden), lambda i: (0, 0)),
                pl.BlockSpec((hidden, OUT_PAD), lambda i: (0, 0)),
                pl.BlockSpec((1, OUT_PAD), lambda i: (0, 0)),
            ],
            # Constant index_map -> output block is VMEM-resident across all steps
            # and doubles as the logits accumulator (no separate scratch).
            out_specs=pl.BlockSpec((B_pad, OUT_PAD), lambda i: (0, 0)),
        ),
        compiler_params=pltpu.CompilerParams(
            # dim=0 log-softmax couples all batch tiles -> reduction-style axis.
            dimension_semantics=("arbitrary",),
            vmem_limit_bytes=int(vmem_limit),
        ),
    )(x_bf, w1_bf, b1, w2_bf, b2, w3_bf, b3p)

    return out[:B, :out_dim]


def _init_linear(key, in_features, out_features):
    """Deterministic PyTorch-style init; returns (in,out) W and (1,out) b, f32."""
    kw, kb = jax.random.split(key)
    bound = 1.0 / jnp.sqrt(in_features)
    w = jax.random.uniform(kw, (out_features, in_features), jnp.float32, -bound, bound)
    b = jax.random.uniform(kb, (out_features,), jnp.float32, -bound, bound)
    return w.T, b.reshape(1, out_features)


def _reference(x, w1, b1, w2, b2, w3, b3):
    # Same bf16-inputs / f32-accumulate matmul recipe as the kernel.
    def mm(a, w):
        return jnp.dot(a.astype(jnp.bfloat16), w.astype(jnp.bfloat16),
                       preferred_element_type=jnp.float32)
    h = jax.nn.relu(mm(x, w1) + b1)
    h = jax.nn.relu(mm(h, w2) + b2)
    logits = mm(h, w3) + b3
    return jax.nn.log_softmax(logits, axis=0)


if __name__ == "__main__":
    in_dim, hidden_dim, out_dim = 32, 64, 8
    batch = 64  # collapses to a single grid step (block_b = 64)

    key = jax.random.PRNGKey(0)
    kx, k1, k2, k3 = jax.random.split(key, 4)

    x = jax.random.normal(kx, (batch, in_dim), jnp.float32)
    w1, b1 = _init_linear(k1, in_dim, hidden_dim)
    w2, b2 = _init_linear(k2, hidden_dim, hidden_dim)
    w3, b3 = _init_linear(k3, hidden_dim, out_dim)

    out = classifier_mlp_forward(x, w1, b1, w2, b2, w3, b3)
    out = jax.block_until_ready(out)

    ref = _reference(x, w1, b1, w2, b2, w3, b3)
    assert out.shape == (batch, out_dim)
    assert jnp.allclose(out, ref, atol=1e-3, rtol=1e-3), "mismatch vs reference"

    print("KERNEL_OK")
</pallas_src>

<mosaic_0001>
module attributes {stable_mosaic.version = 11 : i64} {
  func.func @_mlp_kernel(%arg0: i32, %arg1: memref<64x32xbf16, #tpu.memory_space<vmem>>, %arg2: memref<32x64xbf16, #tpu.memory_space<vmem>>, %arg3: memref<1x64xf32, #tpu.memory_space<vmem>>, %arg4: memref<64x64xbf16, #tpu.memory_space<vmem>>, %arg5: memref<1x64xf32, #tpu.memory_space<vmem>>, %arg6: memref<64x128xbf16, #tpu.memory_space<vmem>>, %arg7: memref<1x128xf32, #tpu.memory_space<vmem>>, %arg8: memref<64x128xf32, #tpu.memory_space<vmem>>) attributes {dimension_semantics = [#tpu.dimension_semantics<arbitrary>], iteration_bounds = array<i64: 1>, scalar_prefetch = 0 : i64, scratch_operands = 0 : i64, tpu.core_type = #tpu.core_type<tc>, window_params = [{transform_indices = @transform_0, window_bounds = array<i64: 64, 32>}, {pipeline_mode = #tpu.pipeline_mode<synchronous>, transform_indices = @transform_1, window_bounds = array<i64: 32, 64>}, {pipeline_mode = #tpu.pipeline_mode<synchronous>, transform_indices = @transform_2, window_bounds = array<i64: 1, 64>}, {pipeline_mode = #tpu.pipeline_mode<synchronous>, transform_indices = @transform_3, window_bounds = array<i64: 64, 64>}, {pipeline_mode = #tpu.pipeline_mode<synchronous>, transform_indices = @transform_4, window_bounds = array<i64: 1, 64>}, {pipeline_mode = #tpu.pipeline_mode<synchronous>, transform_indices = @transform_5, window_bounds = array<i64: 64, 128>}, {pipeline_mode = #tpu.pipeline_mode<synchronous>, transform_indices = @transform_6, window_bounds = array<i64: 1, 128>}, {pipeline_mode = #tpu.pipeline_mode<synchronous>, transform_indices = @transform_7, window_bounds = array<i64: 64, 128>}]} {
    %c0 = arith.constant 0 : index
    %c0_0 = arith.constant 0 : index
    %0 = vector.load %arg1[%c0, %c0_0] : memref<64x32xbf16, #tpu.memory_space<vmem>>, vector<64x32xbf16>
    %c0_1 = arith.constant 0 : index
    %c0_2 = arith.constant 0 : index
    %1 = vector.load %arg2[%c0_1, %c0_2] : memref<32x64xbf16, #tpu.memory_space<vmem>>, vector<32x64xbf16>
    %cst = arith.constant dense<0.000000e+00> : vector<64x64xf32>
    %2 = tpu.matmul %0, %1, %cst {dimension_numbers = #tpu.dot_dimension_numbers<[1], [0], [0], [1], [0, 0, 1, 1], [], []>} : vector<64x32xbf16>, vector<32x64xbf16>, vector<64x64xf32> -> vector<64x64xf32>
    %c0_3 = arith.constant 0 : index
    %c0_4 = arith.constant 0 : index
    %3 = vector.load %arg3[%c0_3, %c0_4] : memref<1x64xf32, #tpu.memory_space<vmem>>, vector<1x64xf32>
    %4 = vector.broadcast %3 : vector<1x64xf32> to vector<64x64xf32>
    %5 = arith.addf %2, %4 : vector<64x64xf32>
    %cst_5 = arith.constant 0.000000e+00 : f32
    %6 = vector.broadcast %cst_5 : f32 to vector<64x64xf32>
    %7 = arith.maximumf %5, %6 : vector<64x64xf32>
    %8 = arith.truncf %7 : vector<64x64xf32> to vector<64x64xbf16>
    %c0_6 = arith.constant 0 : index
    %c0_7 = arith.constant 0 : index
    %9 = vector.load %arg4[%c0_6, %c0_7] : memref<64x64xbf16, #tpu.memory_space<vmem>>, vector<64x64xbf16>
    %cst_8 = arith.constant dense<0.000000e+00> : vector<64x64xf32>
    %10 = tpu.matmul %8, %9, %cst_8 {dimension_numbers = #tpu.dot_dimension_numbers<[1], [0], [0], [1], [0, 0, 1, 1], [], []>} : vector<64x64xbf16>, vector<64x64xbf16>, vector<64x64xf32> -> vector<64x64xf32>
    %c0_9 = arith.constant 0 : index
    %c0_10 = arith.constant 0 : index
    %11 = vector.load %arg5[%c0_9, %c0_10] : memref<1x64xf32, #tpu.memory_space<vmem>>, vector<1x64xf32>
    %12 = vector.broadcast %11 : vector<1x64xf32> to vector<64x64xf32>
    %13 = arith.addf %10, %12 : vector<64x64xf32>
    %cst_11 = arith.constant 0.000000e+00 : f32
    %14 = vector.broadcast %cst_11 : f32 to vector<64x64xf32>
    %15 = arith.maximumf %13, %14 : vector<64x64xf32>
    %16 = arith.truncf %15 : vector<64x64xf32> to vector<64x64xbf16>
    %c0_12 = arith.constant 0 : index
    %c0_13 = arith.constant 0 : index
    %17 = vector.load %arg6[%c0_12, %c0_13] : memref<64x128xbf16, #tpu.memory_space<vmem>>, vector<64x128xbf16>
    %cst_14 = arith.constant dense<0.000000e+00> : vector<64x128xf32>
    %18 = tpu.matmul %16, %17, %cst_14 {dimension_numbers = #tpu.dot_dimension_numbers<[1], [0], [0], [1], [0, 0, 1, 1], [], []>} : vector<64x64xbf16>, vector<64x128xbf16>, vector<64x128xf32> -> vector<64x128xf32>
    %c0_15 = arith.constant 0 : index
    %c0_16 = arith.constant 0 : index
    %19 = vector.load %arg7[%c0_15, %c0_16] : memref<1x128xf32, #tpu.memory_space<vmem>>, vector<1x128xf32>
    %20 = vector.broadcast %19 : vector<1x128xf32> to vector<64x128xf32>
    %21 = arith.addf %18, %20 : vector<64x128xf32>
    %c64_i32 = arith.constant 64 : i32
    %22 = arith.muli %arg0, %c64_i32 : i32
    %23 = tpu.assume_multiple %22, 64 : i32
    %24 = arith.index_cast %23 : i32 to index
    %c0_17 = arith.constant 0 : index
    %25 = vector.load %arg8[%24, %c0_17] : memref<64x128xf32, #tpu.memory_space<vmem>>, vector<64x128xf32>
    tpu.vector_store %arg8[%24, %c0_17], %21 {strides = array<i32>} : memref<64x128xf32, #tpu.memory_space<vmem>>, vector<64x128xf32>,
    %c0_i32 = arith.constant 0 : i32
    %26 = arith.cmpi eq, %arg0, %c0_i32 : i32
    %27 = arith.extui %26 : i1 to i32
    %c0_i32_18 = arith.constant 0 : i32
    %28 = arith.cmpi ne, %27, %c0_i32_18 : i32
    scf.if %28 {
      %29 = tpu.iota {dimensions = array<i32: 0>} : vector<64x128xi32>
      %c64_i32_19 = arith.constant 64 : i32
      %30 = vector.broadcast %c64_i32_19 : i32 to vector<64x128xi32>
      %31 = arith.cmpi slt, %29, %30 : vector<64x128xi32>
      %c0_20 = arith.constant 0 : index
      %c0_21 = arith.constant 0 : index
      %32 = vector.load %arg8[%c0_20, %c0_21] : memref<64x128xf32, #tpu.memory_space<vmem>>, vector<64x128xf32>
      %cst_22 = arith.constant 0xFF800000 : f32
      %33 = vector.broadcast %cst_22 : f32 to vector<64x128xf32>
      %34 = arith.select %31, %32, %33 : vector<64x128xi1>, vector<64x128xf32>
      %cst_23 = arith.constant dense<0xFF800000> : vector<128xf32>
      %35 = vector.multi_reduction <maximumf>, %34, %cst_23 [0] : vector<64x128xf32> to vector<128xf32>
      %36 = vector.shape_cast %35 : vector<128xf32> to vector<1x128xf32>
      %37 = vector.broadcast %36 : vector<1x128xf32> to vector<64x128xf32>
      %38 = arith.subf %34, %37 : vector<64x128xf32>
      %39 = math.exp %38 : vector<64x128xf32>
      %cst_24 = arith.constant dense<0.000000e+00> : vector<128xf32>
      %40 = vector.multi_reduction <add>, %39, %cst_24 [0] : vector<64x128xf32> to vector<128xf32>
      %41 = vector.shape_cast %40 : vector<128xf32> to vector<1x128xf32>
      %42 = math.log %41 : vector<1x128xf32>
      %43 = arith.addf %36, %42 : vector<1x128xf32>
      %44 = vector.broadcast %43 : vector<1x128xf32> to vector<64x128xf32>
      %45 = arith.subf %34, %44 : vector<64x128xf32>
      %c0_25 = arith.constant 0 : index
      %c0_26 = arith.constant 0 : index
      %46 = vector.load %arg8[%c0_25, %c0_26] : memref<64x128xf32, #tpu.memory_space<vmem>>, vector<64x128xf32>
      tpu.vector_store %arg8[%c0_25, %c0_26], %45 {strides = array<i32>} : memref<64x128xf32, #tpu.memory_space<vmem>>, vector<64x128xf32>,
    } else {
    }
    return
  }
  func.func @transform_0(%arg0: i32) -> (i32, i32) {
    %c0_i32 = arith.constant 0 : i32
    %c0_i32_0 = arith.constant 0 : i32
    return %arg0, %c0_i32 : i32, i32
  }
  func.func @transform_1(%arg0: i32) -> (i32, i32) {
    %c0_i32 = arith.constant 0 : i32
    %c0_i32_0 = arith.constant 0 : i32
    %c0_i32_1 = arith.constant 0 : i32
    return %c0_i32, %c0_i32_0 : i32, i32
  }
  func.func @transform_2(%arg0: i32) -> (i32, i32) {
    %c0_i32 = arith.constant 0 : i32
    %c0_i32_0 = arith.constant 0 : i32
    %c0_i32_1 = arith.constant 0 : i32
    return %c0_i32, %c0_i32_0 : i32, i32
  }
  func.func @transform_3(%arg0: i32) -> (i32, i32) {
    %c0_i32 = arith.constant 0 : i32
    %c0_i32_0 = arith.constant 0 : i32
    %c0_i32_1 = arith.constant 0 : i32
    return %c0_i32, %c0_i32_0 : i32, i32
  }
  func.func @transform_4(%arg0: i32) -> (i32, i32) {
    %c0_i32 = arith.constant 0 : i32
    %c0_i32_0 = arith.constant 0 : i32
    %c0_i32_1 = arith.constant 0 : i32
    return %c0_i32, %c0_i32_0 : i32, i32
  }
  func.func @transform_5(%arg0: i32) -> (i32, i32) {
    %c0_i32 = arith.constant 0 : i32
    %c0_i32_0 = arith.constant 0 : i32
    %c0_i32_1 = arith.constant 0 : i32
    return %c0_i32, %c0_i32_0 : i32, i32
  }
  func.func @transform_6(%arg0: i32) -> (i32, i32) {
    %c0_i32 = arith.constant 0 : i32
    %c0_i32_0 = arith.constant 0 : i32
    %c0_i32_1 = arith.constant 0 : i32
    return %c0_i32, %c0_i32_0 : i32, i32
  }
  func.func @transform_7(%arg0: i32) -> (i32, i32) {
    %c0_i32 = arith.constant 0 : i32
    %c0_i32_0 = arith.constant 0 : i32
    %c0_i32_1 = arith.constant 0 : i32
    return %c0_i32, %c0_i32_0 : i32, i32
  }
}

</mosaic_0001>

<bundles_post_ra>
// kernel: tpu_custom_call.1
= control target key start
LH: loop header
LB: loop body
LE: loop exit
PB: predicated region body
PF: predicated region fallthrough
CT: control target
= control target key end

     0   :  { %12 = vsyncpa [#allocation3], 0  ;;  %s909_s0 = inlined_call_operand.vmem [shape: bf16[64,32], index: 0, kind: input, shape index: {}]   ;;  %s910_s1 = inlined_call_operand.hbm [shape: bf16[32,64], index: 1, kind: input, shape index: {}]   ;;  %s911_s2 = inlined_call_operand.vmem [shape: f32[1,64], index: 2, kind: input, shape index: {}]   ;;  %s912_s3 = inlined_call_operand.vmem [shape: bf16[64,64], index: 3, kind: input, shape index: {}]   ;;  %s913_s4 = inlined_call_operand.vmem [shape: f32[1,64], index: 4, kind: input, shape index: {}]   ;;  %s914_s5 = inlined_call_operand.vmem [shape: bf16[64,128], index: 5, kind: input, shape index: {}]   ;;  %s915_s6 = inlined_call_operand.vmem [shape: f32[1,128], index: 6, kind: input, shape index: {}]   ;;  %s916_s7 = inlined_call_operand.hbm [shape: f32[64,128], index: 7, kind: output, shape index: {}]  }
   0x1   :  { %13 = vsyncpa [#allocation4], 0  ;;  %s742_s24 = smov [#allocation2]   ;;  %s694_s28 = scalar_lea.hbm %s910_s1, 256 }
   0x2   :  { %s21_s25 = sshll.u32 %s742_s24, 4  ;;  %p695_p0 = scmp.ne.s32.totalorder %s910_s1, %s694_s28  ;;  %s22_s25 = int_to_ptr.vmem [resolvable:$true] %s21_s25 }
   0x3   :  { %p698_p1 = scmp.lt.u32.totalorder %s694_s28, %s910_s1 }
   0x5   :  { %p700_p2 = pnand %p698_p1, %p695_p0 }
   0x7   :  { %703 = shalt.err (!%p700_p2)
}
   0x8   :  { %s704_s10 = scalar_lea.vmem %s22_s25, 256  ;;  %p709_p4 = scmp.lt.s32.totalorder %s22_s25, %s22_s25 }
   0x9   :  { %p705_p3 = scmp.ne.s32.totalorder %s22_s25, %s704_s10  ;;  %p710_p5 = scmp.lt.s32.totalorder %s704_s10, %s704_s10 }
   0xb   :  { %p711_p6 = por %p710_p5, %p709_p4 }
   0xd   :  { %p712_p7 = pnand %p711_p6, %p705_p3 }
   0xf   :  { %715 = shalt.err (!%p712_p7)
}
  0x10   :  { %s743_s11 = smov 64   ;;  %s744_s12 = smov 4  }
  0x11   :  { %27 = dma.hbm_to_vmem [thread:$0]  %s910_s1, 256, %s22_s25, [#allocation3], %s743_s11, %s743_s11, %s744_s12  }
  0x12   :  { %738 = dma.done.wait [#allocation3], 256  }
  0x13   :  { %739 = vsyncadd [#allocation3], 4294967040  ;;  %v662_v0 = vld [vmem:[#allocation2] sm:$0xff]   ;;  %v663_v1 = vld [vmem:[#allocation2 + $0x8] sm:$0xff]   ;;  %vm93_vm0 = vcmask 261120   ;;  %vm222_vm1 = vcmask 523264  }
  0x14   :  { %612 = vmatprep.subr.bf16.mxu0 %v662_v0  ;;  %v664_v2 = vld [vmem:[%s909_s0] sm:$0xff]   ;;  %v665_v3 = vld [vmem:[%s909_s0 + $0x8] sm:$0xff]   ;;  %v666_v4 = vld [vmem:[%s909_s0 + $0x10] sm:$0xff]  }
  0x15   :  { %613 = vmatpush3.bf16.msra.mxu0 %v662_v0  ;;  %616 = vmatprep.mubr.msk.bf16.mxu0 %vm93_vm0, %v664_v2  ;;  %v668_v5 = vld [vmem:[%s912_s3] sm:$0xff]   ;;  %v669_v6 = vld [vmem:[%s912_s3 + $0x8] sm:$0xff]   ;;  %v667_v7 = vld [vmem:[%s909_s0 + $0x18] sm:$0xff]  }
  0x16   :  { %614 = vmatprep.subr.bf16.mxu0 %v663_v1  ;;  %624 = vmatprep.subr.bf16.mxu1 %v668_v5  ;;  %v670_v8 = vld [vmem:[%s912_s3 + $0x10] sm:$0xff]   ;;  %v671_v9 = vld [vmem:[%s912_s3 + $0x18] sm:$0xff]   ;;  %v672_v10 = vld [vmem:[%s914_s5] sm:$0xff]  }
  0x17   :  { %625 = vmatpush3.bf16.msra.mxu1 %v668_v5  ;;  %v673_v11 = vld [vmem:[%s914_s5 + $0x8] sm:$0xff]   ;;  %v561_v12 = vld [vmem:[%s911_s2] ss:$0 sm:$0xff]  ;;  %v674_v41 = vld [vmem:[%s914_s5 + $0x10] sm:$0xff]  }
  0x18   :  { %626 = vmatprep.subr.bf16.mxu1 %v669_v6  ;;  %v675_v42 = vld [vmem:[%s914_s5 + $0x18] sm:$0xff]   ;;  %v572_v43 = vld [vmem:[%s913_s4] ss:$0 sm:$0xff] }
  0x19   :  { %615 = vmatpush3.bf16.msra.mxu0 %v663_v1 }
  0x1a   :  { %640 = vmatprep.subr.bf16.mxu0 %v672_v10 }
  0x1b   :  { %627 = vmatpush3.bf16.msra.mxu1 %v669_v6 }
  0x1c   :  { %617 = vmatmul.mubr.msk.bf16.vlgmr.msra.gmra.mrb[0].mxu0 %vm93_vm0, %v665_v3  ;;  %628 = vmatprep.subr.bf16.mxu1 %v670_v8 }
  0x1d   :  { %620 = vmatprep.mubr.msk.bf16.mxu0 %vm93_vm0, %v666_v4  ;;  %641 = vmatpush3.bf16.msra.mxu0 %v672_v10 }
  0x1e   :  { %642 = vmatprep.subr.bf16.mxu0 %v673_v11 }
  0x1f   :  { %629 = vmatpush3.bf16.msra.mxu1 %v670_v8 }
  0x20   :  { %630 = vmatprep.subr.bf16.mxu1 %v671_v9 }
  0x21   :  { %643 = vmatpush3.bf16.msra.mxu0 %v673_v11 }
  0x22   :  { %644 = vmatprep.subr.bf16.mxu0 %v674_v41 }
  0x23   :  { %631 = vmatpush3.bf16.msra.mxu1 %v671_v9 }
  0x24   :  { %621 = vmatmul.mubr.msk.bf16.gmra.mrb[4].mxu0 %vm93_vm0, %v667_v7 }
  0x25   :  { %645 = vmatpush3.bf16.msra.mxu0 %v674_v41 }
  0x26   :  { %646 = vmatprep.subr.bf16.mxu0 %v675_v42 }
  0x29   :  { %647 = vmatpush3.bf16.msra.mxu0 %v675_v42 }
  0xef   :  { %v618_v13 = vpop.f32.mrb[0].mxu0 }
  0xf0   :  { %v149_v14 = vadd.f32 %v618_v13, %v561_v12  ;;  %v140_v15 = vpop.f32.mrb[1].mxu0 }
  0xf1   :  { %v141_v16 = vadd.f32 %v561_v12, %v140_v15  ;;  %v619_v17 = vpop.f32.mrb[2].mxu0 }
  0xf2   :  { %v152_v18 = vadd.f32 %v619_v17, %v561_v12  ;;  %v143_v19 = vpop.f32.mrb[3].mxu0  ;;  %v173_v21 = vmax.f32 %v149_v14, 0.0 }
  0xf3   :  { %v144_v20 = vadd.f32 %v561_v12, %v143_v19  ;;  %v171_v23 = vmax.f32 %v141_v16, 0.0 }
  0xf4   :  { %v174_v22 = vmax.f32 %v152_v18, 0.0 }
  0xf5   :  { %v172_v24 = vmax.f32 %v144_v20, 0.0 }
  0xf6   :  { %v180_v25 = vpack.c.bf16 %v174_v22, %v173_v21 }
  0xf7   :  { %v622_v26 = vpop.f32.mrb[4].mxu0  ;;  %v179_v27 = vpack.c.bf16 %v172_v24, %v171_v23 }
  0xf8   :  { %v165_v28 = vadd.f32 %v622_v26, %v561_v12  ;;  %v156_v29 = vpop.f32.mrb[5].mxu0 }
  0xf9   :  { %v157_v30 = vadd.f32 %v561_v12, %v156_v29  ;;  %v623_v31 = vpop.f32.mrb[6].mxu0  ;;  %632 = vmatprep.mubr.msk.bf16.mxu1 %vm222_vm1, %v179_v27 }
  0xfa   :  { %v168_v32 = vadd.f32 %v623_v31, %v561_v12  ;;  %v159_v33 = vpop.f32.mrb[7].mxu0  ;;  %633 = vmatmul.mubr.msk.bf16.vlgmr.msra.gmra.mrb[0].mxu1 %vm222_vm1, %v180_v25  ;;  %v177_v35 = vmax.f32 %v165_v28, 0.0 }
  0xfb   :  { %v160_v34 = vadd.f32 %v561_v12, %v159_v33  ;;  %v175_v37 = vmax.f32 %v157_v30, 0.0  ;;  %v581_v12 = vld [vmem:[%s915_s6] ss:$0 sm:$0xff]  ;;  %s745_s6 = smov [#allocation5]  }
  0xfc   :  { %v178_v36 = vmax.f32 %v168_v32, 0.0  ;;  %s549_s16 = sshll.u32 %s745_s6, 4  ;;  %s550_s16 = int_to_ptr.vmem [resolvable:$true] %s549_s16 }
  0xfd   :  { %v176_v38 = vmax.f32 %v160_v34, 0.0  ;;  %s716_s17 = scalar_lea.vmem %s550_s16, 1024  ;;  %p721_p9 = scmp.lt.s32.totalorder %s550_s16, %s550_s16 }
  0xfe   :  { %v182_v39 = vpack.c.bf16 %v178_v36, %v177_v35  ;;  %p717_p8 = scmp.ne.s32.totalorder %s550_s16, %s716_s17  ;;  %p722_p10 = scmp.lt.s32.totalorder %s716_s17, %s716_s17 }
  0xff   :  { %v181_v40 = vpack.c.bf16 %v176_v38, %v175_v37 }
 0x100   :  { %p723_p11 = por %p722_p10, %p721_p9 }
 0x101   :  { %636 = vmatprep.mubr.msk.bf16.mxu1 %vm222_vm1, %v181_v40 }
 0x102   :  { %637 = vmatmul.mubr.msk.bf16.gmra.mrb[4].mxu1 %vm222_vm1, %v182_v39  ;;  %p724_p12 = pnand %p723_p11, %p717_p8 }
 0x1cd   :  { %v634_v44 = vpop.f32.mrb[0].mxu1 }
 0x1ce   :  { %v278_v45 = vadd.f32 %v634_v44, %v572_v43  ;;  %v269_v46 = vpop.f32.mrb[1].mxu1 }
 0x1cf   :  { %v270_v47 = vadd.f32 %v572_v43, %v269_v46  ;;  %v635_v48 = vpop.f32.mrb[2].mxu1 }
 0x1d0   :  { %v281_v49 = vadd.f32 %v635_v48, %v572_v43  ;;  %v272_v50 = vpop.f32.mrb[3].mxu1  ;;  %v302_v52 = vmax.f32 %v278_v45, 0.0 }
 0x1d1   :  { %v273_v51 = vadd.f32 %v572_v43, %v272_v50  ;;  %v300_v54 = vmax.f32 %v270_v47, 0.0 }
 0x1d2   :  { %v303_v53 = vmax.f32 %v281_v49, 0.0 }
 0x1d3   :  { %v301_v55 = vmax.f32 %v273_v51, 0.0 }
 0x1d4   :  { %v309_v56 = vpack.c.bf16 %v303_v53, %v302_v52 }
 0x1d5   :  { %v308_v57 = vpack.c.bf16 %v301_v55, %v300_v54  ;;  %v638_v58 = vpop.f32.mrb[4].mxu1 }
 0x1d6   :  { %v294_v59 = vadd.f32 %v638_v58, %v572_v43  ;;  %v285_v60 = vpop.f32.mrb[5].mxu1 }
 0x1d7   :  { %v286_v61 = vadd.f32 %v572_v43, %v285_v60  ;;  %v639_v62 = vpop.f32.mrb[6].mxu1  ;;  %648 = vmatprep.mubr.msk.bf16.mxu0 %vm222_vm1, %v308_v57 }
 0x1d8   :  { %v297_v63 = vadd.f32 %v639_v62, %v572_v43  ;;  %v288_v0 = vpop.f32.mrb[7].mxu1  ;;  %649 = vmatmul.mubr.msk.bf16.vlgmr.msra.gmra.mrb[8].mxu0 %vm222_vm1, %v309_v56  ;;  %v306_v2 = vmax.f32 %v294_v59, 0.0 }
 0x1d9   :  { %v289_v1 = vadd.f32 %v572_v43, %v288_v0  ;;  %v304_v4 = vmax.f32 %v286_v61, 0.0 }
 0x1da   :  { %v307_v3 = vmax.f32 %v297_v63, 0.0 }
 0x1db   :  { %v305_v5 = vmax.f32 %v289_v1, 0.0 }
 0x1dc   :  { %v311_v6 = vpack.c.bf16 %v307_v3, %v306_v2 }
 0x1dd   :  { %v310_v7 = vpack.c.bf16 %v305_v5, %v304_v4 }
 0x1df   :  { %652 = vmatprep.mubr.msk.bf16.mxu0 %vm222_vm1, %v310_v7 }
 0x1e0   :  { %653 = vmatmul.mubr.msk.bf16.gmra.mrb[12].mxu0 %vm222_vm1, %v311_v6 }
 0x2ab   :  { %v650_v8 = vpop.f32.mrb[8].mxu0 }
 0x2ac   :  { %v397_v9 = vpop.f32.mrb[9].mxu0  ;;  %v861_v18 = vadd.f32 %v650_v8, %v581_v12 }
 0x2ad   :  { %v651_v10 = vpop.f32.mrb[10].mxu0  ;;  %v867_v22 = vadd.f32 %v581_v12, %v397_v9 }
 0x2ae   :  { %v400_v11 = vpop.f32.mrb[11].mxu0  ;;  %v863_v19 = vadd.f32 %v651_v10, %v581_v12 }
 0x2af   :  { %v869_v23 = vadd.f32 %v581_v12, %v400_v11 }
 0x2b3   :  { %v654_v13 = vpop.f32.mrb[12].mxu0 }
 0x2b4   :  { %v857_v14 = vadd.f32 %v654_v13, %v581_v12  ;;  %v413_v15 = vpop.f32.mrb[13].mxu0 }
 0x2b5   :  { %v859_v16 = vadd.f32 %v581_v12, %v413_v15  ;;  %v655_v17 = vpop.f32.mrb[14].mxu0 }
 0x2b6   :  { %v865_v20 = vadd.f32 %v655_v17, %v581_v12  ;;  %v416_v21 = vpop.f32.mrb[15].mxu0  ;;  %v477_v25 = vmax.f32 %v861_v18, %v857_v14 }
 0x2b7   :  { %v871_v24 = vadd.f32 %v581_v12, %v416_v21  ;;  %v475_v27 = vmax.f32 %v867_v22, %v859_v16 }
 0x2b8   :  { %v478_v26 = vmax.f32 %v863_v19, %v865_v20 }
 0x2b9   :  { %v476_v28 = vmax.f32 %v869_v23, %v871_v24 }
 0x2ba   :  { %v480_v29 = vmax.f32 %v477_v25, %v478_v26 }
 0x2bb   :  { %v479_v30 = vmax.f32 %v475_v27, %v476_v28 }
 0x2bd   :  { %v481_v31 = vmax.f32 %v479_v30, %v480_v29 }
 0x2bf   :  { %v482_v32 = vrot.slane %v481_v31, 4 }
 0x2c1   :  { %v483_v33 = vmax.f32 %v481_v31, %v482_v32 }
 0x2c3   :  { %v484_v34 = vrot.slane %v483_v33, 2 }
 0x2c5   :  { %v485_v35 = vmax.f32 %v483_v33, %v484_v34 }
 0x2c7   :  { %v486_v36 = vrot.slane %v485_v35, 1 }
 0x2c9   :  { %v487_v37 = vmax.f32 %v485_v35, %v486_v36 }
 0x2cb   :  { %v488_v38 = vsub.f32 %v867_v22, %v487_v37  ;;  %v489_v39 = vsub.f32 %v869_v23, %v487_v37  ;;  %v490_v40 = vsub.f32 %v861_v18, %v487_v37  ;;  %v491_v41 = vsub.f32 %v863_v19, %v487_v37 }
 0x2cc   :  { %v492_v44 = vsub.f32 %v859_v16, %v487_v37  ;;  %v493_v46 = vsub.f32 %v871_v24, %v487_v37  ;;  %v494_v48 = vsub.f32 %v857_v14, %v487_v37  ;;  %v495_v50 = vsub.f32 %v865_v20, %v487_v37 }
 0x2cd   :  { %v496_v42 = vmul.f32 1.442695, %v488_v38  ;;  %v498_v43 = vmul.f32 1.442695, %v489_v39  ;;  %v500_v45 = vmul.f32 1.442695, %v490_v40 }
 0x2ce   :  { %v502_v47 = vmul.f32 1.442695, %v491_v41  ;;  %v504_v49 = vmul.f32 1.442695, %v492_v44  ;;  %v506_v51 = vmul.f32 1.442695, %v493_v46 }
 0x2cf   :  { %676 = vpow2.f32 %v496_v42  ;;  %v508_v52 = vmul.f32 1.442695, %v494_v48  ;;  %v510_v53 = vmul.f32 1.442695, %v495_v50 }
 0x2d0   :  { %678 = vpow2.f32 %v498_v43 }
 0x2d1   :  { %680 = vpow2.f32 %v500_v45 }
 0x2d2   :  { %682 = vpow2.f32 %v502_v47 }
 0x2d3   :  { %684 = vpow2.f32 %v504_v49 }
 0x2d4   :  { %686 = vpow2.f32 %v506_v51 }
 0x2d5   :  { %688 = vpow2.f32 %v508_v52 }
 0x2d6   :  { %690 = vpow2.f32 %v510_v53 }
 0x2d9   :  { %v677_v54 = vpop.eup %676 }
 0x2da   :  { %v679_v55 = vpop.eup %678 }
 0x2db   :  { %v512_v56 = vadd.f32 %v679_v55, %v677_v54  ;;  %v681_v57 = vpop.eup %680 }
 0x2dc   :  { %v683_v59 = vpop.eup %682 }
 0x2dd   :  { %v513_v58 = vadd.f32 %v681_v57, %v512_v56  ;;  %v685_v61 = vpop.eup %684 }
 0x2de   :  { %v687_v63 = vpop.eup %686 }
 0x2df   :  { %v514_v60 = vadd.f32 %v683_v59, %v513_v58  ;;  %v689_v1 = vpop.eup %688 }
 0x2e0   :  { %v691_v3 = vpop.eup %690 }
 0x2e1   :  { %v515_v62 = vadd.f32 %v685_v61, %v514_v60 }
 0x2e3   :  { %v516_v0 = vadd.f32 %v687_v63, %v515_v62 }
 0x2e5   :  { %v517_v2 = vadd.f32 %v689_v1, %v516_v0 }
 0x2e7   :  { %v518_v4 = vadd.f32 %v691_v3, %v517_v2 }
 0x2e9   :  { %v519_v5 = vrot.slane %v518_v4, 4 }
 0x2eb   :  { %v520_v6 = vadd.f32 %v519_v5, %v518_v4 }
 0x2ed   :  { %v521_v7 = vrot.slane %v520_v6, 2 }
 0x2ef   :  { %v522_v8 = vadd.f32 %v521_v7, %v520_v6 }
 0x2f1   :  { %v523_v9 = vrot.slane %v522_v8, 1 }
 0x2f3   :  { %v524_v10 = vadd.f32 %v523_v9, %v522_v8 }
 0x2f5   :  { %692 = vlog2.f32 %v524_v10 }
 0x2ff   :  { %v693_v11 = vpop.eup %692 }
 0x300   :  { %v526_v12 = vmul.f32 0.6931472, %v693_v11 }
 0x302   :  { %v527_v13 = vadd.f32 %v526_v12, %v487_v37 }
 0x304   :  { %v528_v15 = vsub.f32 %v867_v22, %v527_v13  ;;  %v529_v17 = vsub.f32 %v869_v23, %v527_v13  ;;  %v530_v21 = vsub.f32 %v861_v18, %v527_v13  ;;  %v531_v25 = vsub.f32 %v863_v19, %v527_v13 }
 0x305   :  { %v532_v26 = vsub.f32 %v859_v16, %v527_v13  ;;  %v533_v27 = vsub.f32 %v871_v24, %v527_v13  ;;  %v534_v28 = vsub.f32 %v857_v14, %v527_v13  ;;  %v535_v29 = vsub.f32 %v865_v20, %v527_v13 }
 0x306   :  { %536 = vst [vmem:[#allocation5] sm:$0xff] %v528_v15  ;;  %537 = vst [vmem:[#allocation5 + $0x8] sm:$0xff] %v529_v17 }
 0x307   :  { %538 = vst [vmem:[#allocation5 + $0x10] sm:$0xff] %v530_v21  ;;  %539 = vst [vmem:[#allocation5 + $0x18] sm:$0xff] %v531_v25 }
 0x308   :  { %540 = vst [vmem:[#allocation5 + $0x20] sm:$0xff] %v532_v26  ;;  %541 = vst [vmem:[#allocation5 + $0x28] sm:$0xff] %v533_v27 }
 0x309   :  { %542 = vst [vmem:[#allocation5 + $0x30] sm:$0xff] %v534_v28  ;;  %543 = vst [vmem:[#allocation5 + $0x38] sm:$0xff] %v535_v29 }
 0x30a   :  { %727 = shalt.err (!%p724_p12)
}
 0x30b   :  { %s728_s1 = scalar_lea.hbm %s916_s7, 1024 }
 0x30c   :  { %p729_p13 = scmp.ne.s32.totalorder %s916_s7, %s728_s1  ;;  %p732_p0 = scmp.lt.u32.totalorder %s728_s1, %s916_s7 }
 0x30e   :  { %p734_p1 = pnand %p732_p0, %p729_p13 }
 0x310   :  { %737 = shalt.err (!%p734_p1)
}
 0x311   :  { %s746_s24 = smov 128   ;;  %s747_s25 = smov 8  }
 0x312   :  { %555 = dma.vmem_to_hbm [thread:$0]  %s550_s16, 1024, %s916_s7, [#allocation4], %s746_s24, %s746_s24, %s747_s25  }
 0x313   :  { %740 = dma.done.wait [#allocation4], 1024  }
 0x314   :  { %741 = vsyncadd [#allocation4], 4294966272 }
 0x315   :  { %559 = vsyncpa [#allocation3], 1 }
 0x316   :  { %560 = vsyncpa [#allocation4], 1 }

</bundles_post_ra>
